<compile_context>
chip_gen: v6e
topology: v6e:2x2x1
jax: 0.10.0
libtpu: 0.0.40
codegen_flags: <defaults>
</compile_context>

<pallas_src>
import functools
import math

import jax
import jax.numpy as jnp
import numpy as np
from jax import lax
from jax.experimental import pallas as pl
from jax.experimental.pallas import tpu as pltpu

BN_EPS = 1e-5
CATEGORICAL = 'Categorical Data'


class Field:
    """Mirror of the torch-side field descriptor used by Vae (data_type + dim())."""

    def __init__(self, data_type, dim):
        self.data_type = data_type
        self._dim = dim

    def dim(self):
        return self._dim


def _round_up(v, m):
    return ((v + m - 1) // m) * m


# --------------------------------------------------------------------------
# Slab layouts (shared between host-side packing and the kernel's static args)
# --------------------------------------------------------------------------
def _vec_layout(input_dim, encoder_dim, encoder_out_dim, latent_dim):
    """Row layout of the f32 vector slab: (name -> (row, width))."""
    specs = [
        ("be1", encoder_dim), ("g1", encoder_dim), ("bt1", encoder_dim),
        ("be2", encoder_out_dim), ("g2", encoder_out_dim), ("bt2", encoder_out_dim),
        ("bmv", 2 * latent_dim),                       # [mu bias | sigma bias]
        ("bd1", encoder_out_dim), ("gd1", encoder_out_dim), ("btd1", encoder_out_dim),
        ("bd2", encoder_dim), ("gd2", encoder_dim), ("btd2", encoder_dim),
        ("bd3", input_dim),
        ("cat", input_dim),                            # 1.0 where column is categorical
        ("seg", input_dim),                            # field index per column
    ]
    rows = {name: (r, w) for r, (name, w) in enumerate(specs)}
    segmat_row = len(specs)                            # seg_mat occupies the next D rows
    total_rows = _round_up(segmat_row + input_dim, 8)
    width = _round_up(max(max(w for _, w in specs), input_dim), 128)
    return rows, segmat_row, total_rows, width


def _weight_layout(input_dim, encoder_dim, encoder_out_dim, latent_dim):
    """Row-offset layout of the bf16 weight slab: (name -> (row_off, in, out))."""
    specs = [
        ("we1", input_dim, encoder_dim),
        ("we2", encoder_dim, encoder_out_dim),
        ("wmv", encoder_out_dim, 2 * latent_dim),      # [W_mu | W_sigma]
        ("wqkv", latent_dim, 3 * latent_dim),          # [W_Q*(1/sqrt(L)) | W_K | W_V]
        ("wd1", latent_dim, encoder_out_dim),
        ("wd2", encoder_out_dim, encoder_dim),
        ("wd3", encoder_dim, input_dim),
    ]
    offs = {}
    off = 0
    for name, i, o in specs:
        offs[name] = (off, i, o)
        off += _round_up(i, 8)                         # sublane-aligned blocks
    total_rows = _round_up(off, 8)
    width = _round_up(max(o for _, _, o in specs), 128)
    return offs, total_rows, width


# --------------------------------------------------------------------------
# Kernel
# --------------------------------------------------------------------------
def _vae_kernel(field_kinds, dims, wl, vl, segmat_row, out_width,
                x_ref, eps_ref, vecs_ref, wts_ref, out_ref):
    f32 = jnp.float32
    bf16 = jnp.bfloat16
    D, enc, eo, L = dims
    B = x_ref.shape[0]

    def vec(name):                                     # (1, width) f32
        r, w = vl[name]
        return vecs_ref[r:r + 1, :w]

    def wt(name):                                      # (in, out) bf16
        off, i, o = wl[name]
        return wts_ref[off:off + i, :o]

    def mm(a, name):                                   # bf16 MXU, f32 accumulate
        return jnp.dot(a.astype(bf16), wt(name), preferred_element_type=f32)

    def bn_relu(h, gname, bname):
        # nn.BatchNorm1d training mode, biased variance.
        # E[x^2] - E[x]^2 form: both reductions are independent (overlap on XLU).
        mean = jnp.mean(h, axis=0, keepdims=True)
        mean_sq = jnp.mean(h * h, axis=0, keepdims=True)
        var = jnp.maximum(mean_sq - mean * mean, 0.0)
        y = (h - mean) * lax.rsqrt(var + BN_EPS) * vec(gname) + vec(bname)
        return jnp.maximum(y, 0.0)

    # ---- encoder: Linear -> BN -> ReLU -> Linear -> BN -> ReLU ----
    x = x_ref[...]
    h1 = bn_relu(mm(x, "we1") + vec("be1"), "g1", "bt1")
    out1 = bn_relu(mm(h1, "we2") + vec("be2"), "g2", "bt2")

    # TODO(synk): `z = self.en_to_la(out1)` in the torch forward is dead code
    # (never used nor returned), so it is skipped here.

    # ---- fused latent heads: [mu | log_var] in one matmul ----
    mulv = mm(out1, "wmv") + vec("bmv")                # (B, 2L), lane-contiguous
    mu = mulv[:, :L]
    log_var = mulv[:, L:2 * L]

    # ---- reparameterize: z = mu + eps * exp(0.5 * log_var) ----
    z = mu + eps_ref[...] * jnp.exp(0.5 * log_var)

    # ---- attention_score (torch bias terms are zeros) ----
    # Q/K/V fused into one matmul; 1/sqrt(L) is pre-folded into W_Q (ReLU is
    # positively homogeneous so the math is unchanged).
    qkv = jnp.maximum(mm(z, "wqkv"), 0.0)              # (B, 3L)
    q = qkv[:, :L]
    k = qkv[:, L:2 * L]
    v = qkv[:, 2 * L:3 * L]
    # scores == Q.T @ K, contracting the batch axis directly on the MXU.
    scores = lax.dot_general(q, k, (((0,), (0,)), ((), ())),
                             preferred_element_type=f32)
    sm = jnp.max(scores, axis=1, keepdims=True)
    se = jnp.exp(scores - sm)
    attn = se / jnp.sum(se, axis=1, keepdims=True)     # softmax over dim=1
    z_attn = jnp.maximum(jnp.dot(v, attn, preferred_element_type=f32), 0.0)

    # ---- decoder: Linear -> BN -> ReLU -> Linear -> BN -> ReLU -> Linear ----
    d1 = bn_relu(mm(z_attn, "wd1") + vec("bd1"), "gd1", "btd1")
    d2 = bn_relu(mm(d1, "wd2") + vec("bd2"), "gd2", "btd2")
    out = mm(d2, "wd3") + vec("bd3")                   # (B, D)

    # ---- per-field decode ----
    cat = vec("cat") > 0.5                             # (1, D) bool
    seg_id = vec("seg")                                # (1, D) f32
    seg_mat = vecs_ref[segmat_row:segmat_row + D, :D]  # (D, D) same-field membership, f32

    col = lax.broadcasted_iota(jnp.int32, out.shape, 1)
    seg_max = jnp.zeros_like(out)
    one_hot = jnp.zeros_like(out)
    # One pass per categorical field (unrolled at trace time). The per-field
    # max serves double duty: softmax shift (exact per-segment softmax, no
    # cross-field underflow) AND argmax key for the one-hot.
    for s, kind in enumerate(field_kinds):
        if kind != CATEGORICAL:
            continue
        fmask = seg_id == f32(s)                       # (1, D)
        masked = jnp.where(fmask, out, f32(-1e30))
        fmax = jnp.max(masked, axis=1, keepdims=True)  # (B, 1) per-field max
        seg_max = jnp.where(fmask, fmax, seg_max)
        cand = jnp.where(masked == fmax, col, jnp.int32(D))
        first = jnp.min(cand, axis=1, keepdims=True)   # first max index (torch.argmax)
        one_hot = one_hot + jnp.where(col == first, 1.0, 0.0)

    # Exact per-segment softmax: exp shifted by the per-segment max, segment
    # sums via ONE matmul with the same-field membership matrix, exact divide.
    e = jnp.where(cat, jnp.exp(out - seg_max), 0.0)
    seg_sum = jnp.dot(e, seg_mat, preferred_element_type=f32)
    seg_sum = jnp.where(cat, seg_sum, 1.0)             # avoid 0/0 on numerical cols
    probs = e / seg_sum

    sig = jax.nn.sigmoid(out)
    decodes = jnp.where(cat, probs, sig)
    out_decodes = jnp.where(cat, one_hot, sig)

    # ---- single lane-dense packed store (split in the wrapper) ----
    pieces = [z_attn, mulv, decodes, out_decodes]      # [z_ | mu | log_var | dec | out_dec]
    packed_w = 3 * L + 2 * D
    if out_width > packed_w:
        pieces.append(jnp.zeros((B, out_width - packed_w), f32))
    out_ref[...] = jnp.concatenate(pieces, axis=1)


# --------------------------------------------------------------------------
# Host-side packing (done ONCE; two lane-dense slabs instead of ~31 tiny DMAs)
# --------------------------------------------------------------------------
def pack_params(params, fields, input_dim, encoder_dim, encoder_out_dim, latent_dim):
    (we1, be1, g1, bt1,
     we2, be2, g2, bt2,
     wmu, bmu, wsg, bsg,
     wq, wk, wv,
     wd1, bd1, gd1, btd1,
     wd2, bd2, gd2, btd2,
     wd3, bd3) = params

    vl, segmat_row, vrows, vwidth = _vec_layout(input_dim, encoder_dim,
                                                encoder_out_dim, latent_dim)
    wl, wrows, wwidth = _weight_layout(input_dim, encoder_dim,
                                       encoder_out_dim, latent_dim)

    # Field metadata (trace-time constants).
    seg, catm = [], []
    for s, f in enumerate(fields):
        d = f.dim() if f.data_type == CATEGORICAL else 1
        seg += [s] * d
        catm += [1.0 if f.data_type == CATEGORICAL else 0.0] * d
    assert len(seg) == input_dim, "fields do not match input_dim"
    seg_np = np.asarray(seg, np.float32)
    seg_mat_np = (seg_np[:, None] == seg_np[None, :]).astype(np.float32)

    # f32 vector slab: biases, BN params, cat mask, seg ids, seg_mat.
    vecs = np.zeros((vrows, vwidth), np.float32)

    def put(name, v):
        r, w = vl[name]
        v = np.asarray(v, np.float32).reshape(-1)
        assert v.shape[0] == w
        vecs[r, :w] = v

    put("be1", be1); put("g1", g1); put("bt1", bt1)
    put("be2", be2); put("g2", g2); put("bt2", bt2)
    put("bmv", np.concatenate([np.asarray(bmu).reshape(-1),
                               np.asarray(bsg).reshape(-1)]))
    put("bd1", bd1); put("gd1", gd1); put("btd1", btd1)
    put("bd2", bd2); put("gd2", gd2); put("btd2", btd2)
    put("bd3", bd3)
    put("cat", np.asarray(catm, np.float32))
    put("seg", seg_np)
    vecs[segmat_row:segmat_row + input_dim, :input_dim] = seg_mat_np

    # bf16 weight slab: all weight matrices stacked along the sublane axis.
    wts = np.zeros((wrows, wwidth), np.float32)

    def putw(name, w):
        off, i, o = wl[name]
        w = np.asarray(w, np.float32)
        assert w.shape == (i, o)
        wts[off:off + i, :o] = w

    attn_scale = 1.0 / math.sqrt(float(latent_dim))    # folded into W_Q (ReLU pos.-homog.)
    putw("we1", we1)
    putw("we2", we2)
    putw("wmv", np.concatenate([np.asarray(wmu), np.asarray(wsg)], axis=1))
    putw("wqkv", np.concatenate([np.asarray(wq) * attn_scale,
                                 np.asarray(wk), np.asarray(wv)], axis=1))
    putw("wd1", wd1)
    putw("wd2", wd2)
    putw("wd3", wd3)

    return jnp.asarray(vecs), jnp.asarray(wts, dtype=jnp.bfloat16)


# --------------------------------------------------------------------------
# Wrapper
# --------------------------------------------------------------------------
def vae_forward(x, eps, vecs, wts, fields,
                input_dim, encoder_dim, encoder_out_dim, latent_dim):
    B = x.shape[0]
    D, enc, eo, L = input_dim, encoder_dim, encoder_out_dim, latent_dim
    field_kinds = tuple(f.data_type for f in fields)

    vl, segmat_row, _, _ = _vec_layout(D, enc, eo, L)
    wl, _, _ = _weight_layout(D, enc, eo, L)

    packed_w = 3 * L + 2 * D
    out_width = _round_up(packed_w, 128)               # lane-dense output slab

    kernel = functools.partial(_vae_kernel, field_kinds, (D, enc, eo, L),
                               wl, vl, segmat_row, out_width)
    vmem = pl.BlockSpec(memory_space=pltpu.MemorySpace.VMEM)
    inputs = (x, eps, vecs, wts)

    # Advisory cost estimate so XLA schedules this tiny call tightly.
    flops = 2 * B * (D * enc + enc * eo + eo * (2 * L) + L * (3 * L)
                     + L * eo + eo * enc + enc * D + D * D + 2 * L * L)
    transcendentals = B * (L + 3 * D) + L * L + 2 * B * (enc + eo)
    bytes_accessed = sum(int(a.size) * a.dtype.itemsize for a in inputs) \
        + B * out_width * 4

    packed = pl.pallas_call(
        kernel,
        out_shape=jax.ShapeDtypeStruct((B, out_width), jnp.float32),
        in_specs=[vmem] * len(inputs),
        out_specs=vmem,
        cost_estimate=pl.CostEstimate(flops=int(flops),
                                      transcendentals=int(transcendentals),
                                      bytes_accessed=int(bytes_accessed)),
    )(*inputs)

    z_ = packed[:, 0:L]
    mu = packed[:, L:2 * L]
    log_var = packed[:, 2 * L:3 * L]
    decodes = packed[:, 3 * L:3 * L + D]
    out_decodes = packed[:, 3 * L + D:3 * L + 2 * D]
    return z_, mu, log_var, decodes, out_decodes


def init_params(key, input_dim, encoder_dim, encoder_out_dim, latent_dim):
    """Deterministic synthetic parameters matching the shapes implied by Vae.__init__."""
    def normal(k, shape, scale):
        return (scale * jax.random.normal(k, shape, dtype=jnp.float32)).astype(jnp.float32)

    keys = jax.random.split(key, 10)
    xav = 1.0 / jnp.sqrt(jnp.float32(latent_dim) / 2.0)   # xavier() scale in attention_score
    f32 = jnp.float32
    params = (
        normal(keys[0], (input_dim, encoder_dim), 0.01),          # encoder Linear 1 W
        jnp.zeros((1, encoder_dim), f32),                          # encoder Linear 1 b
        jnp.ones((1, encoder_dim), f32),                           # BN1 gamma
        jnp.zeros((1, encoder_dim), f32),                          # BN1 beta
        normal(keys[1], (encoder_dim, encoder_out_dim), 0.01),     # encoder Linear 2 W
        jnp.zeros((1, encoder_out_dim), f32),                      # encoder Linear 2 b
        jnp.ones((1, encoder_out_dim), f32),                       # BN2 gamma
        jnp.zeros((1, encoder_out_dim), f32),                      # BN2 beta
        normal(keys[2], (encoder_out_dim, latent_dim), 0.01),      # mu W
        jnp.zeros((1, latent_dim), f32),                           # mu b
        normal(keys[3], (encoder_out_dim, latent_dim), 0.01),      # sigma W
        jnp.zeros((1, latent_dim), f32),                           # sigma b
        normal(keys[4], (latent_dim, latent_dim), xav),            # G_WQ
        normal(keys[5], (latent_dim, latent_dim), xav),            # G_WK
        normal(keys[6], (latent_dim, latent_dim), xav),            # G_WV
        normal(keys[7], (latent_dim, encoder_out_dim), 0.01),      # linear_1 W
        jnp.zeros((1, encoder_out_dim), f32),                      # linear_1 b
        jnp.ones((1, encoder_out_dim), f32),                       # batch_normal1 gamma
        jnp.zeros((1, encoder_out_dim), f32),                      # batch_normal1 beta
        normal(keys[8], (encoder_out_dim, encoder_dim), 0.01),     # linear_2 W
        jnp.zeros((1, encoder_dim), f32),                          # linear_2 b
        jnp.ones((1, encoder_dim), f32),                           # batch_normal2 gamma
        jnp.zeros((1, encoder_dim), f32),                          # batch_normal2 beta
        normal(keys[9], (encoder_dim, input_dim), 0.01),           # linear_3 W
        jnp.zeros((1, input_dim), f32),                            # linear_3 b
    )
    return params


if __name__ == "__main__":
    B = 8
    fields = [
        Field(CATEGORICAL, 6),
        Field('Numerical Data', 1),
        Field(CATEGORICAL, 4),
        Field('Numerical Data', 1),
    ]
    input_dim = sum(f.dim() if f.data_type == CATEGORICAL else 1 for f in fields)  # 12
    encoder_dim, encoder_out_dim, latent_dim = 32, 24, 16

    key = jax.random.PRNGKey(0)
    k_x, k_eps, k_p = jax.random.split(key, 3)
    x = jax.random.normal(k_x, (B, input_dim), dtype=jnp.float32)
    eps = jax.random.normal(k_eps, (B, latent_dim), dtype=jnp.float32)  # randn_like in parameterize
    params = init_params(k_p, input_dim, encoder_dim, encoder_out_dim, latent_dim)

    # Pack parameters + field metadata ONCE into two lane-dense slabs.
    vecs, wts = pack_params(params, fields, input_dim, encoder_dim,
                            encoder_out_dim, latent_dim)

    z_, mu, log_var, decodes, out_decodes = vae_forward(
        x, eps, vecs, wts, fields, input_dim, encoder_dim, encoder_out_dim, latent_dim)
    jax.block_until_ready((z_, mu, log_var, decodes, out_decodes))

    assert z_.shape == (B, latent_dim)
    assert mu.shape == (B, latent_dim)
    assert log_var.shape == (B, latent_dim)
    assert decodes.shape == (B, input_dim)
    assert out_decodes.shape == (B, input_dim)
    assert bool(jnp.all(jnp.isfinite(decodes))) and bool(jnp.all(jnp.isfinite(out_decodes)))

    # Per-categorical-field sanity: softmax rows sum to 1, one-hot rows sum to 1.
    off = 0
    dec_np = np.asarray(decodes)
    ohe_np = np.asarray(out_decodes)
    for f in fields:
        d = f.dim() if f.data_type == CATEGORICAL else 1
        if f.data_type == CATEGORICAL:
            assert np.allclose(dec_np[:, off:off + d].sum(axis=1), 1.0, atol=1e-3)
            assert np.allclose(ohe_np[:, off:off + d].sum(axis=1), 1.0)
        off += d

    print("KERNEL_OK")
</pallas_src>

<mosaic_0001>
module attributes {stable_mosaic.version = 11 : i64} {
  func.func @_vae_kernel(%arg0: memref<8x12xf32, #tpu.memory_space<vmem>>, %arg1: memref<8x16xf32, #tpu.memory_space<vmem>>, %arg2: memref<32x128xf32, #tpu.memory_space<vmem>>, %arg3: memref<160x128xbf16, #tpu.memory_space<vmem>>, %arg4: memref<8x128xf32, #tpu.memory_space<vmem>>) attributes {dimension_semantics = [], scalar_prefetch = 0 : i64, scratch_operands = 0 : i64, tpu.core_type = #tpu.core_type<tc>} {
    %c0 = arith.constant 0 : index
    %c0_0 = arith.constant 0 : index
    %0 = vector.load %arg0[%c0, %c0_0] : memref<8x12xf32, #tpu.memory_space<vmem>>, vector<8x12xf32>
    %1 = arith.truncf %0 : vector<8x12xf32> to vector<8x12xbf16>
    %c0_1 = arith.constant 0 : index
    %c0_2 = arith.constant 0 : index
    %2 = vector.load %arg3[%c0_1, %c0_2] : memref<160x128xbf16, #tpu.memory_space<vmem>>, vector<12x32xbf16>
    %cst = arith.constant dense<0.000000e+00> : vector<8x32xf32>
    %3 = tpu.matmul %1, %2, %cst {dimension_numbers = #tpu.dot_dimension_numbers<[1], [0], [0], [1], [0, 0, 1, 1], [], []>} : vector<8x12xbf16>, vector<12x32xbf16>, vector<8x32xf32> -> vector<8x32xf32>
    %c0_3 = arith.constant 0 : index
    %c0_4 = arith.constant 0 : index
    %4 = vector.load %arg2[%c0_3, %c0_4] : memref<32x128xf32, #tpu.memory_space<vmem>>, vector<1x32xf32>
    %5 = vector.broadcast %4 : vector<1x32xf32> to vector<8x32xf32>
    %6 = arith.addf %3, %5 : vector<8x32xf32>
    %cst_5 = arith.constant dense<0.000000e+00> : vector<32xf32>
    %7 = vector.multi_reduction <add>, %6, %cst_5 [0] : vector<8x32xf32> to vector<32xf32>
    %8 = vector.shape_cast %7 : vector<32xf32> to vector<1x32xf32>
    %cst_6 = arith.constant 8.000000e+00 : f32
    %9 = vector.broadcast %cst_6 : f32 to vector<1x32xf32>
    %10 = arith.divf %8, %9 : vector<1x32xf32>
    %11 = arith.mulf %6, %6 : vector<8x32xf32>
    %cst_7 = arith.constant dense<0.000000e+00> : vector<32xf32>
    %12 = vector.multi_reduction <add>, %11, %cst_7 [0] : vector<8x32xf32> to vector<32xf32>
    %13 = vector.shape_cast %12 : vector<32xf32> to vector<1x32xf32>
    %cst_8 = arith.constant 8.000000e+00 : f32
    %14 = vector.broadcast %cst_8 : f32 to vector<1x32xf32>
    %15 = arith.divf %13, %14 : vector<1x32xf32>
    %16 = arith.mulf %10, %10 : vector<1x32xf32>
    %17 = arith.subf %15, %16 : vector<1x32xf32>
    %cst_9 = arith.constant 0.000000e+00 : f32
    %18 = vector.broadcast %cst_9 : f32 to vector<1x32xf32>
    %19 = arith.maximumf %17, %18 : vector<1x32xf32>
    %20 = vector.broadcast %10 : vector<1x32xf32> to vector<8x32xf32>
    %21 = arith.subf %6, %20 : vector<8x32xf32>
    %cst_10 = arith.constant 9.99999974E-6 : f32
    %22 = vector.broadcast %cst_10 : f32 to vector<1x32xf32>
    %23 = arith.addf %19, %22 : vector<1x32xf32>
    %24 = math.rsqrt %23 : vector<1x32xf32>
    %25 = vector.broadcast %24 : vector<1x32xf32> to vector<8x32xf32>
    %26 = arith.mulf %21, %25 : vector<8x32xf32>
    %c1 = arith.constant 1 : index
    %c0_11 = arith.constant 0 : index
    %27 = vector.load %arg2[%c1, %c0_11] : memref<32x128xf32, #tpu.memory_space<vmem>>, vector<1x32xf32>
    %28 = vector.broadcast %27 : vector<1x32xf32> to vector<8x32xf32>
    %29 = arith.mulf %26, %28 : vector<8x32xf32>
    %c2 = arith.constant 2 : index
    %c0_12 = arith.constant 0 : index
    %30 = vector.load %arg2[%c2, %c0_12] : memref<32x128xf32, #tpu.memory_space<vmem>>, vector<1x32xf32>
    %31 = vector.broadcast %30 : vector<1x32xf32> to vector<8x32xf32>
    %32 = arith.addf %29, %31 : vector<8x32xf32>
    %cst_13 = arith.constant 0.000000e+00 : f32
    %33 = vector.broadcast %cst_13 : f32 to vector<8x32xf32>
    %34 = arith.maximumf %32, %33 : vector<8x32xf32>
    %35 = arith.truncf %34 : vector<8x32xf32> to vector<8x32xbf16>
    %c16 = arith.constant 16 : index
    %c0_14 = arith.constant 0 : index
    %36 = vector.load %arg3[%c16, %c0_14] : memref<160x128xbf16, #tpu.memory_space<vmem>>, vector<32x24xbf16>
    %cst_15 = arith.constant dense<0.000000e+00> : vector<8x24xf32>
    %37 = tpu.matmul %35, %36, %cst_15 {dimension_numbers = #tpu.dot_dimension_numbers<[1], [0], [0], [1], [0, 0, 1, 1], [], []>} : vector<8x32xbf16>, vector<32x24xbf16>, vector<8x24xf32> -> vector<8x24xf32>
    %c3 = arith.constant 3 : index
    %c0_16 = arith.constant 0 : index
    %38 = vector.load %arg2[%c3, %c0_16] : memref<32x128xf32, #tpu.memory_space<vmem>>, vector<1x24xf32>
    %39 = vector.broadcast %38 : vector<1x24xf32> to vector<8x24xf32>
    %40 = arith.addf %37, %39 : vector<8x24xf32>
    %cst_17 = arith.constant dense<0.000000e+00> : vector<24xf32>
    %41 = vector.multi_reduction <add>, %40, %cst_17 [0] : vector<8x24xf32> to vector<24xf32>
    %42 = vector.shape_cast %41 : vector<24xf32> to vector<1x24xf32>
    %cst_18 = arith.constant 8.000000e+00 : f32
    %43 = vector.broadcast %cst_18 : f32 to vector<1x24xf32>
    %44 = arith.divf %42, %43 : vector<1x24xf32>
    %45 = arith.mulf %40, %40 : vector<8x24xf32>
    %cst_19 = arith.constant dense<0.000000e+00> : vector<24xf32>
    %46 = vector.multi_reduction <add>, %45, %cst_19 [0] : vector<8x24xf32> to vector<24xf32>
    %47 = vector.shape_cast %46 : vector<24xf32> to vector<1x24xf32>
    %cst_20 = arith.constant 8.000000e+00 : f32
    %48 = vector.broadcast %cst_20 : f32 to vector<1x24xf32>
    %49 = arith.divf %47, %48 : vector<1x24xf32>
    %50 = arith.mulf %44, %44 : vector<1x24xf32>
    %51 = arith.subf %49, %50 : vector<1x24xf32>
    %cst_21 = arith.constant 0.000000e+00 : f32
    %52 = vector.broadcast %cst_21 : f32 to vector<1x24xf32>
    %53 = arith.maximumf %51, %52 : vector<1x24xf32>
    %54 = vector.broadcast %44 : vector<1x24xf32> to vector<8x24xf32>
    %55 = arith.subf %40, %54 : vector<8x24xf32>
    %cst_22 = arith.constant 9.99999974E-6 : f32
    %56 = vector.broadcast %cst_22 : f32 to vector<1x24xf32>
    %57 = arith.addf %53, %56 : vector<1x24xf32>
    %58 = math.rsqrt %57 : vector<1x24xf32>
    %59 = vector.broadcast %58 : vector<1x24xf32> to vector<8x24xf32>
    %60 = arith.mulf %55, %59 : vector<8x24xf32>
    %c4 = arith.constant 4 : index
    %c0_23 = arith.constant 0 : index
    %61 = vector.load %arg2[%c4, %c0_23] : memref<32x128xf32, #tpu.memory_space<vmem>>, vector<1x24xf32>
    %62 = vector.broadcast %61 : vector<1x24xf32> to vector<8x24xf32>
    %63 = arith.mulf %60, %62 : vector<8x24xf32>
    %c5 = arith.constant 5 : index
    %c0_24 = arith.constant 0 : index
    %64 = vector.load %arg2[%c5, %c0_24] : memref<32x128xf32, #tpu.memory_space<vmem>>, vector<1x24xf32>
    %65 = vector.broadcast %64 : vector<1x24xf32> to vector<8x24xf32>
    %66 = arith.addf %63, %65 : vector<8x24xf32>
    %cst_25 = arith.constant 0.000000e+00 : f32
    %67 = vector.broadcast %cst_25 : f32 to vector<8x24xf32>
    %68 = arith.maximumf %66, %67 : vector<8x24xf32>
    %69 = arith.truncf %68 : vector<8x24xf32> to vector<8x24xbf16>
    %c48 = arith.constant 48 : index
    %c0_26 = arith.constant 0 : index
    %70 = vector.load %arg3[%c48, %c0_26] : memref<160x128xbf16, #tpu.memory_space<vmem>>, vector<24x32xbf16>
    %cst_27 = arith.constant dense<0.000000e+00> : vector<8x32xf32>
    %71 = tpu.matmul %69, %70, %cst_27 {dimension_numbers = #tpu.dot_dimension_numbers<[1], [0], [0], [1], [0, 0, 1, 1], [], []>} : vector<8x24xbf16>, vector<24x32xbf16>, vector<8x32xf32> -> vector<8x32xf32>
    %c6 = arith.constant 6 : index
    %c0_28 = arith.constant 0 : index
    %72 = vector.load %arg2[%c6, %c0_28] : memref<32x128xf32, #tpu.memory_space<vmem>>, vector<1x32xf32>
    %73 = vector.broadcast %72 : vector<1x32xf32> to vector<8x32xf32>
    %74 = arith.addf %71, %73 : vector<8x32xf32>
    %75 = vector.extract_strided_slice %74 {offsets = [0, 0], sizes = [8, 16], strides = [1, 1]} : vector<8x32xf32> to vector<8x16xf32>
    %76 = vector.extract_strided_slice %74 {offsets = [0, 16], sizes = [8, 16], strides = [1, 1]} : vector<8x32xf32> to vector<8x16xf32>
    %c0_29 = arith.constant 0 : index
    %c0_30 = arith.constant 0 : index
    %77 = vector.load %arg1[%c0_29, %c0_30] : memref<8x16xf32, #tpu.memory_space<vmem>>, vector<8x16xf32>
    %cst_31 = arith.constant 5.000000e-01 : f32
    %78 = vector.broadcast %cst_31 : f32 to vector<8x16xf32>
    %79 = arith.mulf %78, %76 : vector<8x16xf32>
    %80 = math.exp %79 : vector<8x16xf32>
    %81 = arith.mulf %77, %80 : vector<8x16xf32>
    %82 = arith.addf %75, %81 : vector<8x16xf32>
    %83 = arith.truncf %82 : vector<8x16xf32> to vector<8x16xbf16>
    %c72 = arith.constant 72 : index
    %c0_32 = arith.constant 0 : index
    %84 = vector.load %arg3[%c72, %c0_32] : memref<160x128xbf16, #tpu.memory_space<vmem>>, vector<16x48xbf16>
    %cst_33 = arith.constant dense<0.000000e+00> : vector<8x48xf32>
    %85 = tpu.matmul %83, %84, %cst_33 {dimension_numbers = #tpu.dot_dimension_numbers<[1], [0], [0], [1], [0, 0, 1, 1], [], []>} : vector<8x16xbf16>, vector<16x48xbf16>, vector<8x48xf32> -> vector<8x48xf32>
    %cst_34 = arith.constant 0.000000e+00 : f32
    %86 = vector.broadcast %cst_34 : f32 to vector<8x48xf32>
    %87 = arith.maximumf %85, %86 : vector<8x48xf32>
    %88 = vector.extract_strided_slice %87 {offsets = [0, 0], sizes = [8, 16], strides = [1, 1]} : vector<8x48xf32> to vector<8x16xf32>
    %89 = vector.extract_strided_slice %87 {offsets = [0, 16], sizes = [8, 16], strides = [1, 1]} : vector<8x48xf32> to vector<8x16xf32>
    %90 = vector.extract_strided_slice %87 {offsets = [0, 32], sizes = [8, 16], strides = [1, 1]} : vector<8x48xf32> to vector<8x16xf32>
    %cst_35 = arith.constant dense<0.000000e+00> : vector<16x16xf32>
    %91 = tpu.matmul %88, %89, %cst_35 {dimension_numbers = #tpu.dot_dimension_numbers<[0], [0], [1], [1], [0, 1, 1, 1], [], []>} : vector<8x16xf32>, vector<8x16xf32>, vector<16x16xf32> -> vector<16x16xf32>
    %cst_36 = arith.constant dense<0xFF800000> : vector<16xf32>
    %92 = vector.multi_reduction <maximumf>, %91, %cst_36 [1] : vector<16x16xf32> to vector<16xf32>
    %93 = vector.shape_cast %92 : vector<16xf32> to vector<16x1xf32>
    %94 = vector.broadcast %93 : vector<16x1xf32> to vector<16x16xf32>
    %95 = arith.subf %91, %94 : vector<16x16xf32>
    %96 = math.exp %95 : vector<16x16xf32>
    %cst_37 = arith.constant dense<0.000000e+00> : vector<16xf32>
    %97 = vector.multi_reduction <add>, %96, %cst_37 [1] : vector<16x16xf32> to vector<16xf32>
    %98 = vector.shape_cast %97 : vector<16xf32> to vector<16x1xf32>
    %99 = vector.broadcast %98 : vector<16x1xf32> to vector<16x16xf32>
    %100 = arith.divf %96, %99 : vector<16x16xf32>
    %cst_38 = arith.constant dense<0.000000e+00> : vector<8x16xf32>
    %101 = tpu.matmul %90, %100, %cst_38 {dimension_numbers = #tpu.dot_dimension_numbers<[1], [0], [0], [1], [0, 0, 1, 1], [], []>} : vector<8x16xf32>, vector<16x16xf32>, vector<8x16xf32> -> vector<8x16xf32>
    %cst_39 = arith.constant 0.000000e+00 : f32
    %102 = vector.broadcast %cst_39 : f32 to vector<8x16xf32>
    %103 = arith.maximumf %101, %102 : vector<8x16xf32>
    %104 = arith.truncf %103 : vector<8x16xf32> to vector<8x16xbf16>
    %c88 = arith.constant 88 : index
    %c0_40 = arith.constant 0 : index
    %105 = vector.load %arg3[%c88, %c0_40] : memref<160x128xbf16, #tpu.memory_space<vmem>>, vector<16x24xbf16>
    %cst_41 = arith.constant dense<0.000000e+00> : vector<8x24xf32>
    %106 = tpu.matmul %104, %105, %cst_41 {dimension_numbers = #tpu.dot_dimension_numbers<[1], [0], [0], [1], [0, 0, 1, 1], [], []>} : vector<8x16xbf16>, vector<16x24xbf16>, vector<8x24xf32> -> vector<8x24xf32>
    %c7 = arith.constant 7 : index
    %c0_42 = arith.constant 0 : index
    %107 = vector.load %arg2[%c7, %c0_42] : memref<32x128xf32, #tpu.memory_space<vmem>>, vector<1x24xf32>
    %108 = vector.broadcast %107 : vector<1x24xf32> to vector<8x24xf32>
    %109 = arith.addf %106, %108 : vector<8x24xf32>
    %cst_43 = arith.constant dense<0.000000e+00> : vector<24xf32>
    %110 = vector.multi_reduction <add>, %109, %cst_43 [0] : vector<8x24xf32> to vector<24xf32>
    %111 = vector.shape_cast %110 : vector<24xf32> to vector<1x24xf32>
    %cst_44 = arith.constant 8.000000e+00 : f32
    %112 = vector.broadcast %cst_44 : f32 to vector<1x24xf32>
    %113 = arith.divf %111, %112 : vector<1x24xf32>
    %114 = arith.mulf %109, %109 : vector<8x24xf32>
    %cst_45 = arith.constant dense<0.000000e+00> : vector<24xf32>
    %115 = vector.multi_reduction <add>, %114, %cst_45 [0] : vector<8x24xf32> to vector<24xf32>
    %116 = vector.shape_cast %115 : vector<24xf32> to vector<1x24xf32>
    %cst_46 = arith.constant 8.000000e+00 : f32
    %117 = vector.broadcast %cst_46 : f32 to vector<1x24xf32>
    %118 = arith.divf %116, %117 : vector<1x24xf32>
    %119 = arith.mulf %113, %113 : vector<1x24xf32>
    %120 = arith.subf %118, %119 : vector<1x24xf32>
    %cst_47 = arith.constant 0.000000e+00 : f32
    %121 = vector.broadcast %cst_47 : f32 to vector<1x24xf32>
    %122 = arith.maximumf %120, %121 : vector<1x24xf32>
    %123 = vector.broadcast %113 : vector<1x24xf32> to vector<8x24xf32>
    %124 = arith.subf %109, %123 : vector<8x24xf32>
    %cst_48 = arith.constant 9.99999974E-6 : f32
    %125 = vector.broadcast %cst_48 : f32 to vector<1x24xf32>
    %126 = arith.addf %122, %125 : vector<1x24xf32>
    %127 = math.rsqrt %126 : vector<1x24xf32>
    %128 = vector.broadcast %127 : vector<1x24xf32> to vector<8x24xf32>
    %129 = arith.mulf %124, %128 : vector<8x24xf32>
    %c8 = arith.constant 8 : index
    %c0_49 = arith.constant 0 : index
    %130 = vector.load %arg2[%c8, %c0_49] : memref<32x128xf32, #tpu.memory_space<vmem>>, vector<1x24xf32>
    %131 = vector.broadcast %130 : vector<1x24xf32> to vector<8x24xf32>
    %132 = arith.mulf %129, %131 : vector<8x24xf32>
    %c9 = arith.constant 9 : index
    %c0_50 = arith.constant 0 : index
    %133 = vector.load %arg2[%c9, %c0_50] : memref<32x128xf32, #tpu.memory_space<vmem>>, vector<1x24xf32>
    %134 = vector.broadcast %133 : vector<1x24xf32> to vector<8x24xf32>
    %135 = arith.addf %132, %134 : vector<8x24xf32>
    %cst_51 = arith.constant 0.000000e+00 : f32
    %136 = vector.broadcast %cst_51 : f32 to vector<8x24xf32>
    %137 = arith.maximumf %135, %136 : vector<8x24xf32>
    %138 = arith.truncf %137 : vector<8x24xf32> to vector<8x24xbf16>
    %c104 = arith.constant 104 : index
    %c0_52 = arith.constant 0 : index
    %139 = vector.load %arg3[%c104, %c0_52] : memref<160x128xbf16, #tpu.memory_space<vmem>>, vector<24x32xbf16>
    %cst_53 = arith.constant dense<0.000000e+00> : vector<8x32xf32>
    %140 = tpu.matmul %138, %139, %cst_53 {dimension_numbers = #tpu.dot_dimension_numbers<[1], [0], [0], [1], [0, 0, 1, 1], [], []>} : vector<8x24xbf16>, vector<24x32xbf16>, vector<8x32xf32> -> vector<8x32xf32>
    %c10 = arith.constant 10 : index
    %c0_54 = arith.constant 0 : index
    %141 = vector.load %arg2[%c10, %c0_54] : memref<32x128xf32, #tpu.memory_space<vmem>>, vector<1x32xf32>
    %142 = vector.broadcast %141 : vector<1x32xf32> to vector<8x32xf32>
    %143 = arith.addf %140, %142 : vector<8x32xf32>
    %cst_55 = arith.constant dense<0.000000e+00> : vector<32xf32>
    %144 = vector.multi_reduction <add>, %143, %cst_55 [0] : vector<8x32xf32> to vector<32xf32>
    %145 = vector.shape_cast %144 : vector<32xf32> to vector<1x32xf32>
    %cst_56 = arith.constant 8.000000e+00 : f32
    %146 = vector.broadcast %cst_56 : f32 to vector<1x32xf32>
    %147 = arith.divf %145, %146 : vector<1x32xf32>
    %148 = arith.mulf %143, %143 : vector<8x32xf32>
    %cst_57 = arith.constant dense<0.000000e+00> : vector<32xf32>
    %149 = vector.multi_reduction <add>, %148, %cst_57 [0] : vector<8x32xf32> to vector<32xf32>
    %150 = vector.shape_cast %149 : vector<32xf32> to vector<1x32xf32>
    %cst_58 = arith.constant 8.000000e+00 : f32
    %151 = vector.broadcast %cst_58 : f32 to vector<1x32xf32>
    %152 = arith.divf %150, %151 : vector<1x32xf32>
    %153 = arith.mulf %147, %147 : vector<1x32xf32>
    %154 = arith.subf %152, %153 : vector<1x32xf32>
    %cst_59 = arith.constant 0.000000e+00 : f32
    %155 = vector.broadcast %cst_59 : f32 to vector<1x32xf32>
    %156 = arith.maximumf %154, %155 : vector<1x32xf32>
    %157 = vector.broadcast %147 : vector<1x32xf32> to vector<8x32xf32>
    %158 = arith.subf %143, %157 : vector<8x32xf32>
    %cst_60 = arith.constant 9.99999974E-6 : f32
    %159 = vector.broadcast %cst_60 : f32 to vector<1x32xf32>
    %160 = arith.addf %156, %159 : vector<1x32xf32>
    %161 = math.rsqrt %160 : vector<1x32xf32>
    %162 = vector.broadcast %161 : vector<1x32xf32> to vector<8x32xf32>
    %163 = arith.mulf %158, %162 : vector<8x32xf32>
    %c11 = arith.constant 11 : index
    %c0_61 = arith.constant 0 : index
    %164 = vector.load %arg2[%c11, %c0_61] : memref<32x128xf32, #tpu.memory_space<vmem>>, vector<1x32xf32>
    %165 = vector.broadcast %164 : vector<1x32xf32> to vector<8x32xf32>
    %166 = arith.mulf %163, %165 : vector<8x32xf32>
    %c12 = arith.constant 12 : index
    %c0_62 = arith.constant 0 : index
    %167 = vector.load %arg2[%c12, %c0_62] : memref<32x128xf32, #tpu.memory_space<vmem>>, vector<1x32xf32>
    %168 = vector.broadcast %167 : vector<1x32xf32> to vector<8x32xf32>
    %169 = arith.addf %166, %168 : vector<8x32xf32>
    %cst_63 = arith.constant 0.000000e+00 : f32
    %170 = vector.broadcast %cst_63 : f32 to vector<8x32xf32>
    %171 = arith.maximumf %169, %170 : vector<8x32xf32>
    %172 = arith.truncf %171 : vector<8x32xf32> to vector<8x32xbf16>
    %c128 = arith.constant 128 : index
    %c0_64 = arith.constant 0 : index
    %173 = vector.load %arg3[%c128, %c0_64] : memref<160x128xbf16, #tpu.memory_space<vmem>>, vector<32x12xbf16>
    %cst_65 = arith.constant dense<0.000000e+00> : vector<8x12xf32>
    %174 = tpu.matmul %172, %173, %cst_65 {dimension_numbers = #tpu.dot_dimension_numbers<[1], [0], [0], [1], [0, 0, 1, 1], [], []>} : vector<8x32xbf16>, vector<32x12xbf16>, vector<8x12xf32> -> vector<8x12xf32>
    %c13 = arith.constant 13 : index
    %c0_66 = arith.constant 0 : index
    %175 = vector.load %arg2[%c13, %c0_66] : memref<32x128xf32, #tpu.memory_space<vmem>>, vector<1x12xf32>
    %176 = vector.broadcast %175 : vector<1x12xf32> to vector<8x12xf32>
    %177 = arith.addf %174, %176 : vector<8x12xf32>
    %c14 = arith.constant 14 : index
    %c0_67 = arith.constant 0 : index
    %178 = vector.load %arg2[%c14, %c0_67] : memref<32x128xf32, #tpu.memory_space<vmem>>, vector<1x12xf32>
    %cst_68 = arith.constant 5.000000e-01 : f32
    %179 = vector.broadcast %cst_68 : f32 to vector<1x12xf32>
    %180 = arith.cmpf ogt, %178, %179 : vector<1x12xf32>
    %c15 = arith.constant 15 : index
    %c0_69 = arith.constant 0 : index
    %181 = vector.load %arg2[%c15, %c0_69] : memref<32x128xf32, #tpu.memory_space<vmem>>, vector<1x12xf32>
    %c16_70 = arith.constant 16 : index
    %c0_71 = arith.constant 0 : index
    %182 = vector.load %arg2[%c16_70, %c0_71] : memref<32x128xf32, #tpu.memory_space<vmem>>, vector<12x12xf32>
    %183 = tpu.iota {dimensions = array<i32: 1>} : vector<8x12xi32>
    %cst_72 = arith.constant 0.000000e+00 : f32
    %184 = vector.broadcast %cst_72 : f32 to vector<8x12xf32>
    %cst_73 = arith.constant 0.000000e+00 : f32
    %185 = vector.broadcast %cst_73 : f32 to vector<8x12xf32>
    %cst_74 = arith.constant 0.000000e+00 : f32
    %186 = vector.broadcast %cst_74 : f32 to vector<1x12xf32>
    %187 = arith.cmpf oeq, %181, %186 : vector<1x12xf32>
    %cst_75 = arith.constant -1.000000e+30 : f32
    %188 = vector.shape_cast %187 : vector<1x12xi1> to vector<1x12xi1>
    %189 = vector.broadcast %188 : vector<1x12xi1> to vector<8x12xi1>
    %190 = vector.broadcast %cst_75 : f32 to vector<8x12xf32>
    %191 = arith.select %189, %177, %190 : vector<8x12xi1>, vector<8x12xf32>
    %cst_76 = arith.constant dense<0xFF800000> : vector<8xf32>
    %192 = vector.multi_reduction <maximumf>, %191, %cst_76 [1] : vector<8x12xf32> to vector<8xf32>
    %193 = vector.shape_cast %192 : vector<8xf32> to vector<8x1xf32>
    %194 = vector.shape_cast %187 : vector<1x12xi1> to vector<1x12xi1>
    %195 = vector.broadcast %194 : vector<1x12xi1> to vector<8x12xi1>
    %196 = vector.shape_cast %193 : vector<8x1xf32> to vector<8x1xf32>
    %197 = vector.broadcast %196 : vector<8x1xf32> to vector<8x12xf32>
    %198 = arith.select %195, %197, %184 : vector<8x12xi1>, vector<8x12xf32>
    %199 = vector.broadcast %193 : vector<8x1xf32> to vector<8x12xf32>
    %200 = arith.cmpf oeq, %191, %199 : vector<8x12xf32>
    %c12_i32 = arith.constant 12 : i32
    %201 = vector.broadcast %c12_i32 : i32 to vector<8x12xi32>
    %202 = arith.select %200, %183, %201 : vector<8x12xi1>, vector<8x12xi32>
    %cst_77 = arith.constant dense<2147483647> : vector<8xi32>
    %203 = vector.multi_reduction <minsi>, %202, %cst_77 [1] : vector<8x12xi32> to vector<8xi32>
    %204 = vector.shape_cast %203 : vector<8xi32> to vector<8x1xi32>
    %205 = vector.broadcast %204 : vector<8x1xi32> to vector<8x12xi32>
    %206 = arith.cmpi eq, %183, %205 : vector<8x12xi32>
    %cst_78 = arith.constant 1.000000e+00 : f32
    %cst_79 = arith.constant 0.000000e+00 : f32
    %207 = vector.broadcast %cst_78 : f32 to vector<8x12xf32>
    %208 = vector.broadcast %cst_79 : f32 to vector<8x12xf32>
    %209 = arith.select %206, %207, %208 : vector<8x12xi1>, vector<8x12xf32>
    %210 = arith.addf %185, %209 : vector<8x12xf32>
    %cst_80 = arith.constant 2.000000e+00 : f32
    %211 = vector.broadcast %cst_80 : f32 to vector<1x12xf32>
    %212 = arith.cmpf oeq, %181, %211 : vector<1x12xf32>
    %cst_81 = arith.constant -1.000000e+30 : f32
    %213 = vector.shape_cast %212 : vector<1x12xi1> to vector<1x12xi1>
    %214 = vector.broadcast %213 : vector<1x12xi1> to vector<8x12xi1>
    %215 = vector.broadcast %cst_81 : f32 to vector<8x12xf32>
    %216 = arith.select %214, %177, %215 : vector<8x12xi1>, vector<8x12xf32>
    %cst_82 = arith.constant dense<0xFF800000> : vector<8xf32>
    %217 = vector.multi_reduction <maximumf>, %216, %cst_82 [1] : vector<8x12xf32> to vector<8xf32>
    %218 = vector.shape_cast %217 : vector<8xf32> to vector<8x1xf32>
    %219 = vector.shape_cast %212 : vector<1x12xi1> to vector<1x12xi1>
    %220 = vector.broadcast %219 : vector<1x12xi1> to vector<8x12xi1>
    %221 = vector.shape_cast %218 : vector<8x1xf32> to vector<8x1xf32>
    %222 = vector.broadcast %221 : vector<8x1xf32> to vector<8x12xf32>
    %223 = arith.select %220, %222, %198 : vector<8x12xi1>, vector<8x12xf32>
    %224 = vector.broadcast %218 : vector<8x1xf32> to vector<8x12xf32>
    %225 = arith.cmpf oeq, %216, %224 : vector<8x12xf32>
    %c12_i32_83 = arith.constant 12 : i32
    %226 = vector.broadcast %c12_i32_83 : i32 to vector<8x12xi32>
    %227 = arith.select %225, %183, %226 : vector<8x12xi1>, vector<8x12xi32>
    %cst_84 = arith.constant dense<2147483647> : vector<8xi32>
    %228 = vector.multi_reduction <minsi>, %227, %cst_84 [1] : vector<8x12xi32> to vector<8xi32>
    %229 = vector.shape_cast %228 : vector<8xi32> to vector<8x1xi32>
    %230 = vector.broadcast %229 : vector<8x1xi32> to vector<8x12xi32>
    %231 = arith.cmpi eq, %183, %230 : vector<8x12xi32>
    %cst_85 = arith.constant 1.000000e+00 : f32
    %cst_86 = arith.constant 0.000000e+00 : f32
    %232 = vector.broadcast %cst_85 : f32 to vector<8x12xf32>
    %233 = vector.broadcast %cst_86 : f32 to vector<8x12xf32>
    %234 = arith.select %231, %232, %233 : vector<8x12xi1>, vector<8x12xf32>
    %235 = arith.addf %210, %234 : vector<8x12xf32>
    %236 = arith.subf %177, %223 : vector<8x12xf32>
    %237 = math.exp %236 : vector<8x12xf32>
    %cst_87 = arith.constant 0.000000e+00 : f32
    %238 = vector.shape_cast %180 : vector<1x12xi1> to vector<1x12xi1>
    %239 = vector.broadcast %238 : vector<1x12xi1> to vector<8x12xi1>
    %240 = vector.broadcast %cst_87 : f32 to vector<8x12xf32>
    %241 = arith.select %239, %237, %240 : vector<8x12xi1>, vector<8x12xf32>
    %cst_88 = arith.constant dense<0.000000e+00> : vector<8x12xf32>
    %242 = tpu.matmul %241, %182, %cst_88 {dimension_numbers = #tpu.dot_dimension_numbers<[1], [0], [0], [1], [0, 0, 1, 1], [], []>} : vector<8x12xf32>, vector<12x12xf32>, vector<8x12xf32> -> vector<8x12xf32>
    %cst_89 = arith.constant 1.000000e+00 : f32
    %243 = vector.shape_cast %180 : vector<1x12xi1> to vector<1x12xi1>
    %244 = vector.broadcast %243 : vector<1x12xi1> to vector<8x12xi1>
    %245 = vector.broadcast %cst_89 : f32 to vector<8x12xf32>
    %246 = arith.select %244, %242, %245 : vector<8x12xi1>, vector<8x12xf32>
    %247 = arith.divf %241, %246 : vector<8x12xf32>
    %248 = arith.negf %177 : vector<8x12xf32>
    %249 = math.exp %248 : vector<8x12xf32>
    %cst_90 = arith.constant 1.000000e+00 : f32
    %250 = vector.broadcast %cst_90 : f32 to vector<8x12xf32>
    %251 = arith.addf %250, %249 : vector<8x12xf32>
    %252 = arith.divf %250, %251 : vector<8x12xf32>
    %253 = vector.shape_cast %180 : vector<1x12xi1> to vector<1x12xi1>
    %254 = vector.broadcast %253 : vector<1x12xi1> to vector<8x12xi1>
    %255 = arith.select %254, %247, %252 : vector<8x12xi1>, vector<8x12xf32>
    %256 = vector.shape_cast %180 : vector<1x12xi1> to vector<1x12xi1>
    %257 = vector.broadcast %256 : vector<1x12xi1> to vector<8x12xi1>
    %258 = arith.select %257, %235, %252 : vector<8x12xi1>, vector<8x12xf32>
    %cst_91 = arith.constant 0.000000e+00 : f32
    %259 = vector.broadcast %cst_91 : f32 to vector<8x56xf32>
    %260 = tpu.concatenate %103, %74, %255, %258, %259 in 1 : vector<8x16xf32>, vector<8x32xf32>, vector<8x12xf32>, vector<8x12xf32>, vector<8x56xf32> -> vector<8x128xf32>
    %c0_92 = arith.constant 0 : index
    %c0_93 = arith.constant 0 : index
    %261 = vector.load %arg4[%c0_92, %c0_93] : memref<8x128xf32, #tpu.memory_space<vmem>>, vector<8x128xf32>
    tpu.vector_store %arg4[%c0_92, %c0_93], %260 {strides = array<i32>} : memref<8x128xf32, #tpu.memory_space<vmem>>, vector<8x128xf32>,
    return
  }
}

</mosaic_0001>

<bundles_post_ra>
// kernel: tpu_custom_call.1
= control target key start
LH: loop header
LB: loop body
LE: loop exit
PB: predicated region body
PF: predicated region fallthrough
CT: control target
= control target key end

     0   :  { %9 = vsyncpa [#allocation3], 0  ;;  %s1539_s0 = inlined_call_operand.hbm [shape: f32[8,12], index: 0, kind: input, shape index: {}]   ;;  %s1540_s1 = inlined_call_operand.hbm [shape: f32[8,16], index: 1, kind: input, shape index: {}]   ;;  %s1541_s2 = inlined_call_operand.hbm [shape: f32[32,128], index: 2, kind: input, shape index: {}]   ;;  %s1542_s3 = inlined_call_operand.hbm [shape: bf16[160,128], index: 3, kind: input, shape index: {}]   ;;  %s1543_s4 = inlined_call_operand.hbm [shape: f32[8,128], index: 4, kind: output, shape index: {}]  }
   0x1   :  { %10 = vsyncpa [#allocation6], 0 }
   0x2   :  { %11 = vsyncpa [#allocation9], 0 }
   0x3   :  { %12 = vsyncpa [#allocation4], 0  ;;  %s1379_s15 = smov [#allocation5]   ;;  %s1380_s17 = smov [#allocation2]  }
   0x4   :  { %s29_s16 = sshll.u32 %s1379_s15, 4  ;;  %s19_s18 = sshll.u32 %s1380_s17, 4  ;;  %s30_s16 = int_to_ptr.vmem [resolvable:$true] %s29_s16  ;;  %s20_s18 = int_to_ptr.vmem [resolvable:$true] %s19_s18 }
   0x5   :  { %s1279_s19 = scalar_lea.vmem %s30_s16, 128  ;;  %p1284_p1 = scmp.lt.s32.totalorder %s30_s16, %s30_s16 }
   0x6   :  { %p1280_p0 = scmp.ne.s32.totalorder %s30_s16, %s1279_s19  ;;  %p1285_p2 = scmp.lt.s32.totalorder %s1279_s19, %s1279_s19 }
   0x8   :  { %p1286_p3 = por %p1285_p2, %p1284_p1 }
   0xa   :  { %p1287_p4 = pnand %p1286_p3, %p1280_p0 }
   0xc   :  { %1290 = shalt.err (!%p1287_p4)
}
   0xd   :  { %32 = dma.hbm_to_vmem [thread:$0]  %s1540_s1, 128, %s30_s16, [#allocation6]  }
   0xe   :  { %s1299_s22 = scalar_lea.vmem %s20_s18, 128  ;;  %p1304_p6 = scmp.lt.s32.totalorder %s20_s18, %s20_s18 }
   0xf   :  { %p1300_p5 = scmp.ne.s32.totalorder %s20_s18, %s1299_s22  ;;  %p1305_p7 = scmp.lt.s32.totalorder %s1299_s22, %s1299_s22 }
  0x11   :  { %p1306_p8 = por %p1305_p7, %p1304_p6 }
  0x13   :  { %p1307_p9 = pnand %p1306_p8, %p1300_p5 }
  0x15   :  { %1310 = shalt.err (!%p1307_p9)
}
  0x16   :  { %22 = dma.hbm_to_vmem [thread:$0]  %s1539_s0, 128, %s20_s18, [#allocation3]  }
  0x17   :  { %s1381_s25 = smov [#allocation7]  }
  0x18   :  { %s38_s26 = sshll.u32 %s1381_s25, 4  ;;  %s39_s26 = int_to_ptr.vmem [resolvable:$true] %s38_s26 }
  0x19   :  { %s1319_s27 = scalar_lea.vmem %s39_s26, 512  ;;  %p1324_p11 = scmp.lt.s32.totalorder %s39_s26, %s39_s26 }
  0x1a   :  { %p1320_p10 = scmp.ne.s32.totalorder %s39_s26, %s1319_s27  ;;  %p1325_p12 = scmp.lt.s32.totalorder %s1319_s27, %s1319_s27 }
  0x1c   :  { %p1326_p13 = por %p1325_p12, %p1324_p11 }
  0x1e   :  { %p1327_p0 = pnand %p1326_p13, %p1320_p10 }
  0x20   :  { %1330 = shalt.err (!%p1327_p0)
}
  0x21   :  { %s1382_s1 = smov 128   ;;  %s1383_s28 = smov 8  }
  0x22   :  { %44 = dma.hbm_to_vmem [thread:$0]  %s1541_s2, 512, %s39_s26, [#allocation6], %s1382_s1, %s1382_s1, %s1383_s28  }
  0x23   :  { %s1384_s5 = smov [#allocation8]  }
  0x24   :  { %s50_s6 = sshll.u32 %s1384_s5, 4  ;;  %s51_s6 = int_to_ptr.vmem [resolvable:$true] %s50_s6 }
  0x25   :  { %s1339_s0 = scalar_lea.vmem %s51_s6, 1280  ;;  %p1344_p2 = scmp.lt.s32.totalorder %s51_s6, %s51_s6 }
  0x26   :  { %p1340_p1 = scmp.ne.s32.totalorder %s51_s6, %s1339_s0  ;;  %p1345_p3 = scmp.lt.s32.totalorder %s1339_s0, %s1339_s0 }
  0x28   :  { %p1346_p4 = por %p1345_p3, %p1344_p2 }
  0x2a   :  { %p1347_p5 = pnand %p1346_p4, %p1340_p1 }
  0x2c   :  { %1350 = shalt.err (!%p1347_p5)
}
  0x2d   :  { %s1385_s7 = smov 64   ;;  %s1386_s8 = smov 4  }
  0x2e   :  { %56 = dma.hbm_to_vmem [thread:$0]  %s1542_s3, 1280, %s51_s6, [#allocation9], %s1385_s7, %s1385_s7, %s1386_s8  }
  0x2f   :  { %1371 = dma.done.wait [#allocation3], 128  }
  0x30   :  { %1372 = vsyncadd [#allocation3], 4294967168 }
  0x31   :  { %1373 = dma.done.wait [#allocation6], 640  }
  0x32   :  { %1374 = vsyncadd [#allocation6], 4294966656 }
  0x33   :  { %1375 = dma.done.wait [#allocation9], 1280  }
  0x34   :  { %1376 = vsyncadd [#allocation9], 4294966016  ;;  %v1387_v0 = vmov 0.0   ;;  %vm1388_vm0 = vmmov 0   ;;  %vm88_vm1 = vcmask 1045504   ;;  %v70_v2 = vld [vmem:[#allocation2] sm:$0xff] }
  0x35   :  { %1148 = vmatprep.subr.bf16.mxu0 %v1387_v0  ;;  %1150 = vmatprep.mubr.msk.bf16.mxu0 %vm1388_vm0, %v1387_v0  ;;  %v1234_v1 = vld [vmem:[#allocation8] sm:$0x3f]   ;;  %v71_v4 = vpack.c.bf16 %v70_v2, %v70_v2  ;;  %vm84_vm2 = vcmask 97280   ;;  %v1235_v5 = vld [vmem:[#allocation8 + $0x10] sm:$0xff]   ;;  %v1236_v6 = vld [vmem:[#allocation8 + $0x8] sm:$0xff]   ;;  %vm132_vm3 = vcmask 261120  }
  0x36   :  { %1154 = vmatprep.subr.bf16.mxu1 %v1387_v0  ;;  %1158 = vmatprep.mubr.msk.bf16.mxu1 %vm1388_vm0, %v1387_v0  ;;  %v90_v3 = vsel %vm88_vm1, %v1234_v1, 0  ;;  %v1083_v7 = vld [vmem:[#allocation7] ss:$0 sm:$0xff]  ;;  %v1086_v36 = vld [vmem:[#allocation7 + $0x1] ss:$0 sm:$0xff]  ;;  %vm295_vm4 = vcmask 1043456  }
  0x37   :  { %1149 = vmatpush3.bf16.msra.mxu0 %v90_v3  ;;  %1155 = vmatpush3.bf16.msra.mxu1 %v1235_v5  ;;  %v1087_v38 = vld [vmem:[#allocation7 + $0x2] ss:$0 sm:$0xff]  ;;  %v1237_v43 = vld [vmem:[#allocation8 + $0x20] ss:$0 sps:$4 sm:$0xff]   ;;  %v1238_v45 = vld [vmem:[#allocation8 + $0x18] sm:$0xff]   ;;  %vm236_vm5 = vcmask 195584  }
  0x38   :  { %1162 = vmatprep.subr.bf16.mxu0 %v1387_v0  ;;  %1156 = vmatprep.subr.bf16.mxu1 %v1387_v0  ;;  %v297_v44 = vsel %vm295_vm4, %v1237_v43, 0  ;;  %v1088_v46 = vld [vmem:[#allocation7 + $0x3] ss:$0 sm:$0xff]  ;;  %s1389_s2 = smov 112   ;;  %vm358_vm6 = vcmask 130048   ;;  %vm439_vm7 = vcmask 64512  }
  0x39   :  { %s1390_s3 = smov 96   ;;  %s1391_s11 = smov 16  }
  0x3a   :  { %1151 = vmatmul.mubr.msk.bf16.vlgmr.msra.gmra.mxu0 %vm84_vm2, %v71_v4  ;;  %s1393_s12 = smov 48   ;;  %s1394_s13 = smov 60  }
  0x3b   :  { %1166 = vmatprep.mubr.msk.bf16.mxu0 %vm1388_vm0, %v1387_v0  ;;  %1157 = vmatpush3.bf16.msra.mxu1 %v1236_v6  ;;  %s1395_s14 = smov [#allocation10]  }
  0x3c   :  { %1170 = vmatprep.subr.bf16.mxu1 %v1387_v0  ;;  %1163 = vmatpush3.bf16.msra.mxu0 %v297_v44  ;;  %s1072_s15 = sshll.u32 %s1395_s14, 4  ;;  %s1073_s15 = int_to_ptr.vmem [resolvable:$true] %s1072_s15 }
  0x3d   :  { %1164 = vmatprep.subr.bf16.mxu0 %v1387_v0  ;;  %s1351_s16 = scalar_lea.vmem %s1073_s15, 128  ;;  %p1356_p7 = scmp.lt.s32.totalorder %s1073_s15, %s1073_s15 }
  0x3e   :  { %p1352_p6 = scmp.ne.s32.totalorder %s1073_s15, %s1351_s16  ;;  %p1357_p8 = scmp.lt.s32.totalorder %s1351_s16, %s1351_s16 }
  0x40   :  { %1165 = vmatpush3.bf16.msra.mxu0 %v1238_v45  ;;  %p1358_p9 = por %p1357_p8, %p1356_p7 }
  0x42   :  { %p1359_p10 = pnand %p1358_p9, %p1352_p6 }
  0xfa   :  { %v126_v8 = vpop.f32.mrf.mxu0 }
  0xfb   :  { %v127_v9 = vadd.f32 %v1083_v7, %v126_v8 }
  0xfc   :  { %v1152_v10 = vpop.f32.mrf.mxu0 }
  0xfd   :  { %v133_v11 = vsel %vm132_vm3, %v127_v9, 0.0  ;;  %v142_v12 = vmul.f32 %v127_v9, %v127_v9 }
  0xfe   :  { %v134_v13 = vrot.slane %v133_v11, 4  ;;  %v129_v14 = vpop.f32.mrf.mxu0 }
  0xff   :  { %v143_v15 = vsel %vm132_vm3, %v142_v12, 0.0  ;;  %v1092_v12 = vld [vmem:[#allocation7 + $0x4] ss:$0 sm:$0xff]  ;;  %v1093_v14 = vld [vmem:[#allocation7 + $0x5] ss:$0 sm:$0xff] }
 0x100   :  { %v135_v16 = vadd.f32 %v134_v13, %v133_v11  ;;  %v144_v17 = vrot.slane %v143_v15, 4  ;;  %v1153_v18 = vpop.f32.mrf.mxu0 }
 0x102   :  { %v136_v19 = vrot.slane %v135_v16, 2  ;;  %v145_v20 = vadd.f32 %v144_v17, %v143_v15 }
 0x104   :  { %v137_v21 = vadd.f32 %v136_v19, %v135_v16  ;;  %v146_v22 = vrot.slane %v145_v20, 2  ;;  %v1239_v19 = vld [vmem:[#allocation8 + $0x24] sm:$0xff]  }
 0x106   :  { %v138_v23 = vrot.slane %v137_v21, 1  ;;  %v147_v24 = vadd.f32 %v146_v22, %v145_v20  ;;  %v1094_v20 = vld [vmem:[#allocation7 + $0x6] ss:$0 sm:$0xff] }
 0x108   :  { %v139_v25 = vadd.f32 %v138_v23, %v137_v21  ;;  %v148_v26 = vrot.slane %v147_v24, 1 }
 0x10a   :  { %v141_v27 = vmul.f32 0.125, %v139_v25  ;;  %v149_v28 = vadd.f32 %v148_v26, %v147_v24 }
 0x10c   :  { %v150_v29 = vmul.f32 0.125, %v149_v28  ;;  %v151_v30 = vmul.f32 %v141_v27, %v141_v27  ;;  %v154_v34 = vsub.f32 %v127_v9, %v141_v27 }
 0x10e   :  { %v152_v31 = vsub.f32 %v150_v29, %v151_v30  ;;  %v339_v29 = vld [vmem:[#allocation5] sm:$0xff] }
 0x110   :  { %v153_v32 = vmax.f32 %v152_v31, 0.0 }
 0x112   :  { %v155_v33 = vadd.f32 1e-05, %v153_v32 }
 0x114   :  { %1245 = vrsqrt.f32 %v155_v33 }
 0x121   :  { %v1246_v35 = vpop.eup %1245 }
 0x122   :  { %v157_v37 = vmul.f32 %v1246_v35, %v154_v34 }
 0x124   :  { %v163_v39 = vmul.f32 %v1086_v36, %v157_v37 }
 0x126   :  { %v169_v40 = vadd.f32 %v1087_v38, %v163_v39 }
 0x128   :  { %v170_v41 = vmax.f32 %v169_v40, 0.0 }
 0x12a   :  { %v171_v42 = vpack.c.bf16 %v170_v41, %v170_v41 }
 0x12c   :  { %1159 = vmatmul.mubr.msk.bf16.vlgmr.msra.gmra.mxu1 %vm132_vm3, %v171_v42 }
 0x12d   :  { %1172 = vmatprep.mubr.msk.bf16.mxu1 %vm1388_vm0, %v1387_v0  ;;  %1171 = vmatpush3.bf16.msra.mxu1 %v1239_v19 }
 0x12e   :  { %1188 = vmatprep.subr.bf16.mxu1 %v1387_v0 }
 0x1ec   :  { %v230_v47 = vpop.f32.mrf.mxu1 }
 0x1ed   :  { %v231_v48 = vadd.f32 %v1088_v46, %v230_v47 }
 0x1ee   :  { %v1160_v49 = vpop.f32.mrf.mxu1 }
 0x1ef   :  { %v237_v50 = vsel %vm236_vm5, %v231_v48, 0.0  ;;  %v245_v51 = vmul.f32 %v231_v48, %v231_v48 }
 0x1f0   :  { %v238_v52 = vrot.slane %v237_v50, 4  ;;  %v233_v53 = vpop.f32.mrf.mxu1 }
 0x1f1   :  { %v246_v54 = vsel %vm236_vm5, %v245_v51, 0.0 }
 0x1f2   :  { %v239_v55 = vadd.f32 %v238_v52, %v237_v50  ;;  %v247_v56 = vrot.slane %v246_v54, 4  ;;  %v1161_v57 = vpop.f32.mrf.mxu1 }
 0x1f4   :  { %v240_v58 = vrot.slane %v239_v55, 2  ;;  %v248_v59 = vadd.f32 %v247_v56, %v246_v54  ;;  %v1240_v56 = vld [vmem:[#allocation8 + $0x2c] sm:$0xff]  }
 0x1f6   :  { %v241_v60 = vadd.f32 %v240_v58, %v239_v55  ;;  %v249_v61 = vrot.slane %v248_v59, 2 }
 0x1f8   :  { %v242_v62 = vrot.slane %v241_v60, 1  ;;  %v250_v63 = vadd.f32 %v249_v61, %v248_v59 }
 0x1fa   :  { %v243_v1 = vadd.f32 %v242_v62, %v241_v60  ;;  %v251_v2 = vrot.slane %v250_v63, 1 }
 0x1fc   :  { %v244_v3 = vmul.f32 0.125, %v243_v1  ;;  %v252_v4 = vadd.f32 %v251_v2, %v250_v63 }
 0x1fe   :  { %v253_v5 = vmul.f32 0.125, %v252_v4  ;;  %v254_v6 = vmul.f32 %v244_v3, %v244_v3  ;;  %v257_v10 = vsub.f32 %v231_v48, %v244_v3 }
 0x200   :  { %v255_v7 = vsub.f32 %v253_v5, %v254_v6  ;;  %v1241_v5 = vld [vmem:[#allocation8 + $0x3c] ss:$0 sps:$4 sm:$0xff]  }
 0x201   :  { %v734_v6 = vsel %vm295_vm4, %v1241_v5, 0 }
 0x202   :  { %v256_v8 = vmax.f32 %v255_v7, 0.0  ;;  %v1242_v7 = vld [vmem:[#allocation8 + $0x34] sm:$0xff]  }
 0x204   :  { %v258_v9 = vadd.f32 1e-05, %v256_v8  ;;  %v1103_v8 = vld [vmem:[#allocation7 + $0x7] ss:$0 sm:$0xff] }
 0x206   :  { %1247 = vrsqrt.f32 %v258_v9 }
 0x213   :  { %v1248_v11 = vpop.eup %1247 }
 0x214   :  { %v260_v13 = vmul.f32 %v1248_v11, %v257_v10 }
 0x216   :  { %v266_v15 = vmul.f32 %v1092_v12, %v260_v13 }
 0x218   :  { %v272_v16 = vadd.f32 %v1093_v14, %v266_v15 }
 0x21a   :  { %v273_v17 = vmax.f32 %v272_v16, 0.0 }
 0x21c   :  { %v274_v18 = vpack.c.bf16 %v273_v17, %v273_v17 }
 0x21e   :  { %1167 = vmatmul.mubr.msk.bf16.vlgmr.msra.gmra.mxu0 %vm236_vm5, %v274_v18 }
 0x2de   :  { %v333_v21 = vpop.f32.mrf.mxu0 }
 0x2df   :  { %v334_v22 = vadd.f32 %v1094_v20, %v333_v21 }
 0x2e0   :  { %v1168_v23 = vpop.f32.mrf.mxu0 }
 0x2e1   :  { %v340_v24 = vmul.f32 0.5, %v334_v22 }
 0x2e2   :  { %v336_v25 = vpop.f32.mrf.mxu0 }
 0x2e3   :  { %v341_v26 = vmul.f32 1.442695, %v340_v24 }
 0x2e4   :  { %v1169_v27 = vpop.f32.mrf.mxu0 }
 0x2e5   :  { %1249 = vpow2.f32 %v341_v26 }
 0x2f2   :  { %v1250_v28 = vpop.eup %1249 }
 0x2f3   :  { %344 = vrot.lane.b32.xlu0 %v1250_v28, %s1389_s2 }
 0x365   :  { %v345_v30 = vpop.permute.xlu0 %344 }
 0x366   :  { %v347_v31 = vmul.f32 %v345_v30, %v339_v29 }
 0x368   :  { %v348_v32 = vadd.f32 %v347_v31, %v334_v22 }
 0x36a   :  { %v349_v33 = vpack.c.bf16 %v348_v32, %v348_v32 }
 0x36c   :  { %1173 = vmatmul.mubr.msk.bf16.vlgmr.msra.gmra.mxu1 %vm358_vm6, %v349_v33 }
 0x36d   :  { %1190 = vmatprep.mubr.msk.bf16.mxu1 %vm1388_vm0, %v1387_v0  ;;  %1189 = vmatpush3.bf16.msra.mxu1 %v1240_v56 }
 0x36e   :  { %1202 = vmatprep.subr.bf16.mxu1 %v1387_v0 }
 0x42c   :  { %v396_v34 = vpop.f32.mrf.mxu1 }
 0x42d   :  { %v402_v35 = vmax.f32 %v396_v34, 0.0 }
 0x42e   :  { %v1174_v36 = vpop.f32.mrf.mxu1 }
 0x42f   :  { %403 = vxpose.xlu1.b32.start.end [1/1] (short) (narrow) %v402_v35, 16  ;;  %436 = vrot.lane.b32.xlu0 %v402_v35, %s1389_s2 }
 0x430   :  { %v399_v37 = vpop.f32.mrf.mxu1 }
 0x431   :  { %v1106_v37 = vld [vmem:[#allocation7 + $0x8] ss:$0 sm:$0xff] }
 0x432   :  { %v1175_v38 = vpop.f32.mrf.mxu1 }
 0x4a1   :  { %v437_v39 = vpop.permute.xlu0 %436 }
 0x4a2   :  { %1176 = vmatprep.subr.mxu0 %v437_v39 }
 0x4a3   :  { %1177 = vmatpush3.msra.mxu0 %v437_v39  ;;  %v1107_v39 = vld [vmem:[#allocation7 + $0x9] ss:$0 sm:$0xff] }
 0x4a4   :  { %1181 = vmatprep.subr.mxu0 %v1387_v0 }
 0x4ab   :  { %v419_v40 = vpop.trf.xlu1 }
 0x4ac   :  { %1178 = vmatprep.mubr.msk.f32.mxu0 %vm439_vm7, %v419_v40 }
 0x4af   :  { %v420_v41 = vpop.trf.xlu1 }
 0x4b0   :  { %1179 = vmatmul.mubr.msk.f32.vlgmr.msra.gmra.mxu0 %vm439_vm7, %v420_v41  ;;  %vm1063_vm7 = vcmask 588800  }
 0x4b1   :  { %1185 = vmatprep.mubr.msk.f32.mxu0 %vm1388_vm0, %v1387_v0 }
 0x570   :  { %v1180_v42 = vpop.f32.mrf.mxu0 }
 0x571   :  { %v524_v43 = vsel %vm358_vm6, %v1180_v42, -inf }
 0x572   :  { %525 = vmax.xlane.f32.xlu1 %v524_v43  ;;  %v512_v44 = vpop.f32.mrf.mxu0 }
 0x573   :  { %v521_v45 = vsel %vm358_vm6, %v512_v44, -inf }
 0x574   :  { %522 = vmax.xlane.f32.xlu0 %v521_v45  ;;  %v1244_v45 = vld [vmem:[#allocation8 + $0x40] sm:$0xff]  }
 0x5fb   :  { %v526_v46 = vpop.xlane.xlu1 %525 }
 0x5fc   :  { %v528_v47 = vsub.f32 %v1180_v42, %v526_v46  ;;  %v1108_v46 = vld [vmem:[#allocation7 + $0xa] ss:$0 sm:$0xff] }
 0x5fd   :  { %v523_v48 = vpop.xlane.xlu0 %522 }
 0x5fe   :  { %v531_v49 = vmul.f32 1.442695, %v528_v47  ;;  %v527_v50 = vsub.f32 %v512_v44, %v523_v48  ;;  %v1243_v44 = vld [vmem:[#allocation8 + $0x48] sm:$0xff]  }
 0x600   :  { %1251 = vpow2.f32 %v531_v49  ;;  %v529_v51 = vmul.f32 1.442695, %v527_v50 }
 0x602   :  { %1253 = vpow2.f32 %v529_v51 }
 0x60d   :  { %v1252_v52 = vpop.eup %1251 }
 0x60e   :  { %v536_v53 = vsel %vm358_vm6, %v1252_v52, 0.0 }
 0x60f   :  { %v1254_v54 = vpop.eup %1253  ;;  %537 = vadd.xlane.f32.xlu0 %v536_v53 }
 0x610   :  { %v533_v55 = vsel %vm358_vm6, %v1254_v54, 0.0 }
 0x613   :  { %534 = vadd.xlane.f32.xlu0 %v533_v55 }
 0x629   :  { %543 = vrot.lane.b32.xlu0 %v402_v35, %s1390_s3 }
 0x62d   :  { %1047 = vrot.lane.b32.xlu0 %v334_v22, %s1391_s11 }
 0x698   :  { %v538_v57 = vpop.xlane.xlu0 %537 }
 0x699   :  { %1255 = vrcp.f32 %v538_v57 }
 0x69c   :  { %v535_v58 = vpop.xlane.xlu0 %534 }
 0x69d   :  { %1257 = vrcp.f32 %v535_v58 }
 0x6a0   :  { %v544_v63 = vpop.permute.xlu0 %543 }
 0x6a6   :  { %v1256_v59 = vpop.eup %1255 }
 0x6a7   :  { %v542_v60 = vmul.f32 %v1256_v59, %v1252_v52 }
 0x6a9   :  { %1182 = vmatpush3.msra.mxu0 %v542_v60 }
 0x6aa   :  { %v1258_v61 = vpop.eup %1257  ;;  %1183 = vmatprep.subr.mxu0 %v1387_v0 }
 0x6ab   :  { %v540_v62 = vmul.f32 %v1258_v61, %v1254_v54 }
 0x6ad   :  { %1184 = vmatpush3.msra.mxu0 %v540_v62 }
 0x6ae   :  { %1186 = vmatmul.mubr.msk.f32.vlgmr.msra.gmra.mxu0 %vm358_vm6, %v544_v63  ;;  %1194 = vmatprep.subr.bf16.mxu0 %v1387_v0 }
 0x6af   :  { %1198 = vmatprep.mubr.msk.bf16.mxu0 %vm1388_vm0, %v1387_v0  ;;  %1195 = vmatpush3.bf16.msra.mxu0 %v734_v6 }
 0x6b0   :  { %1196 = vmatprep.subr.bf16.mxu0 %v1387_v0 }
 0x6b3   :  { %1197 = vmatpush3.bf16.msra.mxu0 %v1242_v7 }
 0x6b4   :  { %1210 = vmatprep.subr.mxu0 %v1387_v0 }
 0x76e   :  { %v613_v1 = vpop.f32.mrf.mxu0 }
 0x76f   :  { %v1472_v2 = vmax.f32 %v613_v1, 0.0 }
 0x770   :  { %v1187_v3 = vpop.f32.mrf.mxu0 }
 0x771   :  { %v618_v4 = vpack.c.bf16 %v1472_v2, %v1472_v2 }
 0x773   :  { %1191 = vmatmul.mubr.msk.bf16.vlgmr.msra.gmra.mxu1 %vm358_vm6, %v618_v4 }
 0x774   :  { %1206 = vmatprep.mubr.msk.bf16.mxu1 %vm1388_vm0, %v1387_v0  ;;  %1203 = vmatpush3.bf16.msra.mxu1 %v1243_v44  ;;  %v882_v44 = vld [vmem:[#allocation7 + $0x18] sm:$0xf] }
 0x775   :  { %1204 = vmatprep.subr.bf16.mxu1 %v1387_v0 }
 0x778   :  { %1205 = vmatpush3.bf16.msra.mxu1 %v1244_v45  ;;  %v881_v45 = vld [vmem:[#allocation7 + $0x10] sm:$0xff] }
 0x833   :  { %v669_v9 = vpop.f32.mrf.mxu1 }
 0x834   :  { %v670_v10 = vadd.f32 %v1103_v8, %v669_v9 }
 0x835   :  { %v1192_v11 = vpop.f32.mrf.mxu1 }
 0x836   :  { %v675_v12 = vsel %vm236_vm5, %v670_v10, 0.0  ;;  %v683_v13 = vmul.f32 %v670_v10, %v670_v10 }
 0x837   :  { %v676_v14 = vrot.slane %v675_v12, 4  ;;  %v672_v15 = vpop.f32.mrf.mxu1 }
 0x838   :  { %v684_v16 = vsel %vm236_vm5, %v683_v13, 0.0  ;;  %v1112_v13 = vld [vmem:[#allocation7 + $0xb] ss:$0 sm:$0xff]  ;;  %v1113_v15 = vld [vmem:[#allocation7 + $0xc] ss:$0 sm:$0xff] }
 0x839   :  { %v677_v17 = vadd.f32 %v676_v14, %v675_v12  ;;  %v685_v18 = vrot.slane %v684_v16, 4  ;;  %v1193_v19 = vpop.f32.mrf.mxu1 }
 0x83b   :  { %v678_v20 = vrot.slane %v677_v17, 2  ;;  %v686_v21 = vadd.f32 %v685_v18, %v684_v16 }
 0x83d   :  { %v679_v22 = vadd.f32 %v678_v20, %v677_v17  ;;  %v687_v23 = vrot.slane %v686_v21, 2  ;;  %v883_v20 = vlaneseq }
 0x83f   :  { %v680_v24 = vrot.slane %v679_v22, 1  ;;  %v688_v25 = vadd.f32 %v687_v23, %v686_v21  ;;  %v888_v21 = vshrl.u32 %v883_v20, 7 }
 0x841   :  { %v681_v26 = vadd.f32 %v680_v24, %v679_v22  ;;  %v689_v27 = vrot.slane %v688_v25, 1  ;;  %v878_v22 = vld [vmem:[#allocation7 + $0xe] sm:$0x1]  ;;  %v889_v23 = vsub.s32 0, %v888_v21  ;;  %v1392_v24 = vmov 0  }
 0x842   :  { %vm879_vm8 = vcmp.gt.f32.partialorder %v878_v22, 0.5 }
 0x843   :  { %v682_v28 = vmul.f32 0.125, %v681_v26  ;;  %v690_v29 = vadd.f32 %v689_v27, %v688_v25  ;;  %v952_v25 = vsel %vm879_vm8, 1, %v1392_v24  ;;  %v880_v27 = vld [vmem:[#allocation7 + $0xf] sm:$0x1] }
 0x844   :  { %v956_v26 = vrot.slane %v952_v25, %v889_v23  ;;  %vm885_vm9 = vcmp.eq.f32.partialorder %v880_v27, 0.0  ;;  %vm917_vm10 = vcmp.eq.f32.partialorder %v880_v27, 2.0 }
 0x845   :  { %v691_v30 = vmul.f32 0.125, %v690_v29  ;;  %v692_v31 = vmul.f32 %v682_v28, %v682_v28  ;;  %v695_v35 = vsub.f32 %v670_v10, %v682_v28  ;;  %v886_v28 = vsel %vm885_vm9, 1, %v1392_v24 }
 0x846   :  { %v918_v29 = vsel %vm917_vm10, 1, %v1392_v24  ;;  %vm1517_vm15 = vcmp.eq.s32.totalorder %v956_v26, 1 }
 0x847   :  { %v693_v32 = vsub.f32 %v691_v30, %v692_v31  ;;  %v890_v30 = vrot.slane %v886_v28, %v889_v23  ;;  %v1114_v31 = vld [vmem:[#allocation7 + $0xd] ss:$0 sm:$0xff] }
 0x849   :  { %v694_v33 = vmax.f32 %v693_v32, 0.0  ;;  %v922_v32 = vrot.slane %v918_v29, %v889_v23  ;;  %vm1491_vm11 = vcmp.eq.s32.totalorder %v890_v30, 1 }
 0x84b   :  { %v696_v34 = vadd.f32 1e-05, %v694_v33  ;;  %vm1495_vm12 = vcmp.eq.s32.totalorder %v922_v32, 1 }
 0x84d   :  { %1259 = vrsqrt.f32 %v696_v34  ;;  %v1048_v34 = vpop.permute.xlu0 %1047 }
 0x85a   :  { %v1260_v36 = vpop.eup %1259 }
 0x85b   :  { %v698_v38 = vmul.f32 %v1260_v36, %v695_v35 }
 0x85d   :  { %v704_v40 = vmul.f32 %v1106_v37, %v698_v38 }
 0x85f   :  { %v710_v41 = vadd.f32 %v1107_v39, %v704_v40 }
 0x861   :  { %v711_v42 = vmax.f32 %v710_v41, 0.0 }
 0x863   :  { %v712_v43 = vpack.c.bf16 %v711_v42, %v711_v42 }
 0x865   :  { %1199 = vmatmul.mubr.msk.bf16.vlgmr.msra.gmra.mxu0 %vm236_vm5, %v712_v43  ;;  %vm1061_vm5 = vcmask 490496  }
 0x866   :  { %1214 = vmatprep.mubr.msk.f32.mxu0 %vm1388_vm0, %v1387_v0  ;;  %1211 = vmatpush3.msk.msra.mxu0 %vm295_vm4, %v882_v44  ;;  %vm1059_vm4 = vcmask 392192  }
 0x867   :  { %1212 = vmatprep.subr.mxu0 %v1387_v0 }
 0x868   :  { %1213 = vmatpush3.msra.mxu0 %v881_v45 }
 0x925   :  { %v770_v47 = vpop.f32.mrf.mxu0 }
 0x926   :  { %v771_v48 = vadd.f32 %v1108_v46, %v770_v47  ;;  %v1507_v46 = vand.u32 127, %v883_v20 }
 0x927   :  { %v1200_v49 = vpop.f32.mrf.mxu0 }
 0x928   :  { %v776_v50 = vsel %vm132_vm3, %v771_v48, 0.0  ;;  %v784_v51 = vmul.f32 %v771_v48, %v771_v48 }
 0x929   :  { %v777_v52 = vrot.slane %v776_v50, 4  ;;  %v773_v53 = vpop.f32.mrf.mxu0 }
 0x92a   :  { %v785_v54 = vsel %vm132_vm3, %v784_v51, 0.0 }
 0x92b   :  { %v778_v55 = vadd.f32 %v777_v52, %v776_v50  ;;  %v786_v56 = vrot.slane %v785_v54, 4  ;;  %v1201_v57 = vpop.f32.mrf.mxu0 }
 0x92d   :  { %v779_v58 = vrot.slane %v778_v55, 2  ;;  %v787_v59 = vadd.f32 %v786_v56, %v785_v54 }
 0x92f   :  { %v780_v60 = vadd.f32 %v779_v58, %v778_v55  ;;  %v788_v61 = vrot.slane %v787_v59, 2 }
 0x931   :  { %v781_v62 = vrot.slane %v780_v60, 1  ;;  %v789_v63 = vadd.f32 %v788_v61, %v787_v59 }
 0x933   :  { %v782_v1 = vadd.f32 %v781_v62, %v780_v60  ;;  %v790_v3 = vrot.slane %v789_v63, 1 }
 0x935   :  { %v783_v4 = vmul.f32 0.125, %v782_v1  ;;  %v791_v5 = vadd.f32 %v790_v3, %v789_v63 }
 0x937   :  { %v792_v6 = vmul.f32 0.125, %v791_v5  ;;  %v793_v7 = vmul.f32 %v783_v4, %v783_v4  ;;  %v796_v11 = vsub.f32 %v771_v48, %v783_v4 }
 0x939   :  { %v794_v8 = vsub.f32 %v792_v6, %v793_v7 }
 0x93b   :  { %v795_v9 = vmax.f32 %v794_v8, 0.0 }
 0x93d   :  { %v797_v10 = vadd.f32 1e-05, %v795_v9 }
 0x93f   :  { %1261 = vrsqrt.f32 %v797_v10 }
 0x94c   :  { %v1262_v12 = vpop.eup %1261 }
 0x94d   :  { %v799_v14 = vmul.f32 %v1262_v12, %v796_v11 }
 0x94f   :  { %v805_v16 = vmul.f32 %v1112_v13, %v799_v14 }
 0x951   :  { %v811_v17 = vadd.f32 %v1113_v15, %v805_v16 }
 0x953   :  { %v812_v18 = vmax.f32 %v811_v17, 0.0 }
 0x955   :  { %v813_v19 = vpack.c.bf16 %v812_v18, %v812_v18 }
 0x957   :  { %1207 = vmatmul.mubr.msk.bf16.vlgmr.msra.gmra.mxu1 %vm132_vm3, %v813_v19 }
 0xa17   :  { %v872_v33 = vpop.f32.mrf.mxu1 }
 0xa18   :  { %v873_v35 = vadd.f32 %v1114_v31, %v872_v33 }
 0xa19   :  { %v1208_v36 = vpop.f32.mrf.mxu1 }
 0xa1a   :  { %v892_v38 = vsel %vm1491_vm11, %v873_v35, -1e+30  ;;  %v924_v41 = vsel %vm1495_vm12, %v873_v35, -1e+30  ;;  %v1120_v10 = vmul.f32 -1.442695, %v873_v35  ;;  %v1058_v36 = vsel %vm358_vm6, %v1472_v2, %v1048_v34 }
 0xa1b   :  { %v875_v39 = vpop.f32.mrf.mxu1  ;;  %v893_v40 = vsel %vm84_vm2, %v892_v38, -inf  ;;  %v925_v43 = vsel %vm84_vm2, %v924_v41, -inf }
 0xa1c   :  { %894 = vmax.xlane.f32.xlu1 %v893_v40 }
 0xa1d   :  { %v1209_v42 = vpop.f32.mrf.mxu1 }
 0xa20   :  { %926 = vmax.xlane.f32.xlu1 %v925_v43 }
 0xaa5   :  { %v895_v47 = vpop.xlane.xlu1 %894 }
 0xaa6   :  { %vm897_vm13 = vcmp.eq.f32.partialorder %v892_v38, %v895_v47  ;;  %v896_v50 = vsel %vm1491_vm11, %v895_v47, 0.0 }
 0xaa7   :  { %v898_v48 = vsel %vm897_vm13, %v1507_v46, 12 }
 0xaa8   :  { %v899_v49 = vsel %vm84_vm2, %v898_v48, 2147483647 }
 0xaa9   :  { %v927_v51 = vpop.xlane.xlu1 %926  ;;  %v901_v52 = vshra.s32 %v899_v49, 16  ;;  %v900_v1 = vand.u32 65535, %v899_v49 }
 0xaaa   :  { %v928_v53 = vsel %vm1495_vm12, %v927_v51, %v896_v50  ;;  %vm929_vm14 = vcmp.eq.f32.partialorder %v924_v41, %v927_v51 }
 0xaab   :  { %v930_v54 = vsel %vm929_vm14, %v1507_v46, 12  ;;  %v949_v55 = vsub.f32 %v873_v35, %v928_v53  ;;  %v903_v56 = vcvt.s32.f32 %v901_v52  ;;  %v902_v4 = vcvt.s32.f32 %v900_v1 }
 0xaac   :  { %v931_v57 = vsel %vm84_vm2, %v930_v54, 2147483647 }
 0xaad   :  { %v950_v58 = vmul.f32 1.442695, %v949_v55  ;;  %904 = vmin.xlane.f32.xlu1 %v903_v56  ;;  %v933_v59 = vshra.s32 %v931_v57, 16  ;;  %v932_v5 = vand.u32 65535, %v931_v57 }
 0xaaf   :  { %1263 = vpow2.f32 %v950_v58  ;;  %v935_v60 = vcvt.s32.f32 %v933_v59  ;;  %v934_v8 = vcvt.s32.f32 %v932_v5 }
 0xab0   :  { %1265 = vpow2.f32 %v1120_v10 }
 0xab1   :  { %936 = vmin.xlane.f32.xlu1 %v935_v60 }
 0xabc   :  { %v1264_v62 = vpop.eup %1263 }
 0xabd   :  { %v958_v63 = vsel %vm1517_vm15, %v1264_v62, 0.0  ;;  %v1266_v11 = vpop.eup %1265 }
 0xabe   :  { %1215 = vmatmul.mubr.msk.f32.vlgmr.msra.gmra.mxu0 %vm84_vm2, %v958_v63  ;;  %v1041_v12 = vadd.f32 1.0, %v1266_v11 }
 0xb36   :  { %v905_v3 = vpop.xlane.xlu1 %904 }
 0xb37   :  { %vm906_vm0 = vcmp.eq.f32.partialorder %v903_v56, %v905_v3  ;;  %v911_v20 = vcvt.f32.s32 %v905_v3 }
 0xb38   :  { %v907_v6 = vsel %vm906_vm0, %v902_v4, inf }
 0xb39   :  { %908 = vmin.xlane.f32.xlu1 %v907_v6  ;;  %v912_v22 = vshll.u32 %v911_v20, 16 }
 0xb3a   :  { %v937_v7 = vpop.xlane.xlu1 %936 }
 0xb3b   :  { %vm938_vm1 = vcmp.eq.f32.partialorder %v935_v60, %v937_v7  ;;  %v943_v23 = vcvt.f32.s32 %v937_v7 }
 0xb3c   :  { %v939_v9 = vsel %vm938_vm1, %v934_v8, inf }
 0xb3d   :  { %940 = vmin.xlane.f32.xlu1 %v939_v9  ;;  %v944_v27 = vshll.u32 %v943_v23, 16 }
 0xb7e   :  { %v1031_v13 = vpop.f32.mrf.mxu0 }
 0xb7f   :  { %v1035_v14 = vsel %vm1517_vm15, %v1031_v13, 1.0 }
 0xb80   :  { %1267 = vrcp.f32 %v1035_v14  ;;  %v1216_v15 = vpop.f32.mrf.mxu0 }
 0xb81   :  { %1269 = vrcp.f32 %v1041_v12 }
 0xb8d   :  { %v1268_v16 = vpop.eup %1267 }
 0xb8e   :  { %v1037_v17 = vmul.f32 %v1268_v16, %v958_v63  ;;  %v1270_v18 = vpop.eup %1269 }
 0xb90   :  { %v1044_v19 = vsel %vm1517_vm15, %v1037_v17, %v1270_v18 }
 0xb91   :  { %1051 = vrot.lane.b32.xlu1 %v1044_v19, %s1393_s12 }
 0xbc2   :  { %v909_v21 = vpop.xlane.xlu1 %908 }
 0xbc3   :  { %v910_v24 = vcvt.f32.s32 %v909_v21 }
 0xbc5   :  { %v913_v25 = vadd.s32 %v912_v22, %v910_v24 }
 0xbc6   :  { %v941_v26 = vpop.xlane.xlu1 %940 }
 0xbc7   :  { %v942_v28 = vcvt.f32.s32 %v941_v26  ;;  %vm914_vm2 = vcmp.eq.s32.totalorder %v1507_v46, %v913_v25 }
 0xbc8   :  { %v915_v30 = vsel %vm914_vm2, 1.0, %v1387_v0 }
 0xbc9   :  { %v945_v29 = vadd.s32 %v944_v27, %v942_v28 }
 0xbcb   :  { %vm946_vm3 = vcmp.eq.s32.totalorder %v1507_v46, %v945_v29 }
 0xbcc   :  { %v947_v31 = vsel %vm946_vm3, 1.0, %v1387_v0 }
 0xbcd   :  { %v948_v32 = vadd.f32 %v947_v31, %v915_v30 }
 0xbcf   :  { %v1045_v33 = vsel %vm1517_vm15, %v948_v32, %v1270_v18 }
 0xbd0   :  { %1055 = vrot.lane.b32.xlu0 %v1045_v33, %s1394_s13 }
 0xc03   :  { %v1052_v35 = vpop.permute.xlu1 %1051 }
 0xc04   :  { %v1060_v37 = vsel %vm1059_vm4, %v1058_v36, %v1052_v35 }
 0xc42   :  { %v1056_v38 = vpop.permute.xlu0 %1055 }
 0xc43   :  { %v1062_v39 = vsel %vm1061_vm5, %v1060_v37, %v1056_v38 }
 0xc44   :  { %v1064_v0 = vsel %vm1063_vm7, %v1062_v39, 0.0 }
 0xc45   :  { %1065 = vst [vmem:[#allocation10] sm:$0xff] %v1064_v0 }
 0xc46   :  { %1362 = shalt.err (!%p1359_p10)
}
 0xc47   :  { %1075 = dma.vmem_to_hbm [thread:$0]  %s1073_s15, 128, %s1543_s4, [#allocation4]  }
 0xc48   :  { %1377 = dma.done.wait [#allocation4], 128  }
 0xc49   :  { %1378 = vsyncadd [#allocation4], 4294967168 }
 0xc4a   :  { %1079 = vsyncpa [#allocation3], 1 }
 0xc4b   :  { %1080 = vsyncpa [#allocation6], 1 }
 0xc4c   :  { %1081 = vsyncpa [#allocation9], 1 }
 0xc4d   :  { %1082 = vsyncpa [#allocation4], 1 }

</bundles_post_ra>
